<compile_context>
chip_gen: v5e
topology: v5e:2x2
jax: 0.10.0
libtpu: 0.0.40
codegen_flags: <defaults>
</compile_context>

<pallas_src>
import jax
import jax.numpy as jnp
from jax.experimental import pallas as pl
from jax.experimental.pallas import tpu as pltpu

LANES = 128
SUBLANES = 8
NUM_SPLITS = 2            # row-range split across TensorCores (v7x); no-op on 1-TC chips
DEFAULT_TILE_ROWS = 256   # (256, 128) f32 tile = 128 KiB per input block


def kge_moments_kernel(p_ref, t_ref, m_ref):
    """Accumulate raw moments of one (TILE_R, 128) tile into m_ref (5, TILE_R, 128)."""

    @pl.when(pl.program_id(1) == 0)
    def _init():
        m_ref[...] = jnp.zeros_like(m_ref)

    # In-kernel upcast: stream the native dtype from HBM, do math in f32.
    p = p_ref[...].astype(jnp.float32)
    t = t_ref[...].astype(jnp.float32)

    m_ref[0, :, :] = m_ref[0, :, :] + p
    m_ref[1, :, :] = m_ref[1, :, :] + t
    m_ref[2, :, :] = m_ref[2, :, :] + p * p
    m_ref[3, :, :] = m_ref[3, :, :] + t * t
    m_ref[4, :, :] = m_ref[4, :, :] + p * t


def _to_tiles(x, total_rows):
    flat = jnp.reshape(x, (-1,))
    pad = total_rows * LANES - flat.shape[0]
    if pad:
        flat = jnp.pad(flat, (0, pad))              # zeros -> no bias in raw moments
    return jnp.reshape(flat, (total_rows, LANES))


def kge_loss(y_pred, y_true, *, tile_rows=DEFAULT_TILE_ROWS):
    """y_pred, y_true: (N, 1) arrays. Returns the (1,) KGE metric (float32)."""
    n_elems = y_pred.shape[0] * (y_pred.shape[1] if y_pred.ndim > 1 else 1)

    # Lane-dense layout: ceil(N / 128) rows, rounded so the grid tiles evenly.
    min_rows = -(-n_elems // LANES)
    tr = min(tile_rows, ((min_rows + SUBLANES - 1) // SUBLANES) * SUBLANES)
    chunk = NUM_SPLITS * tr
    total_rows = ((min_rows + chunk - 1) // chunk) * chunk
    tiles_per_split = total_rows // chunk
    padded_elems = total_rows * LANES

    p2d = _to_tiles(y_pred, total_rows)
    t2d = _to_tiles(y_true, total_rows)

    in_bytes = jnp.dtype(y_pred.dtype).itemsize + jnp.dtype(y_true.dtype).itemsize
    cost = pl.CostEstimate(
        flops=8 * padded_elems,
        transcendentals=0,
        bytes_accessed=padded_elems * in_bytes + NUM_SPLITS * 5 * tr * LANES * 4,
    )

    partial = pl.pallas_call(
        kge_moments_kernel,
        out_shape=jax.ShapeDtypeStruct((NUM_SPLITS, 5, tr, LANES), jnp.float32),
        grid=(NUM_SPLITS, tiles_per_split),
        in_specs=[
            pl.BlockSpec((tr, LANES), lambda c, i: (c * tiles_per_split + i, 0)),
            pl.BlockSpec((tr, LANES), lambda c, i: (c * tiles_per_split + i, 0)),
        ],
        out_specs=pl.BlockSpec((None, 5, tr, LANES), lambda c, i: (c, 0, 0, 0)),
        compiler_params=pltpu.CompilerParams(
            dimension_semantics=("parallel", "arbitrary")),
        cost_estimate=cost,
    )(p2d, t2d)

    # Finalize (tiny): combine per-core partials, reduce cross-lane once, then
    # the scalar KGE math.  Raw -> centered moments with the true element count.
    sums = jnp.sum(partial, axis=(0, 2, 3), dtype=jnp.float32)   # (5,)
    sum_p, sum_t, sum_p2, sum_t2, sum_pt = (sums[i] for i in range(5))
    n = jnp.float32(n_elems)

    sp2 = sum_p2 - sum_p * sum_p / n     # ~ (N-1)*var(pred); divisors cancel below
    st2 = sum_t2 - sum_t * sum_t / n
    spt = sum_pt - sum_p * sum_t / n

    cc = spt * jax.lax.rsqrt(sp2 * st2)            # Pearson r == corrcoef[0, 1]
    alpha = jnp.sqrt(sp2) * jax.lax.rsqrt(st2)     # std(pred)/std(true) (ddof cancels)
    beta = sum_p / sum_t
    # NOTE: constant inputs or zero-sum truth yield NaN/Inf, same as the PyTorch reference.

    kge = jnp.sqrt((cc - 1.0) ** 2 + (alpha - 1.0) ** 2 + (beta - 1.0) ** 2)
    return jnp.reshape(kge, (1,))


if __name__ == "__main__":
    key = jax.random.PRNGKey(0)
    k1, k2 = jax.random.split(key)
    N = 256
    # Deterministic synthetic "observed" and "simulated" series, shape (N, 1).
    y_true = jax.random.uniform(k1, (N, 1), dtype=jnp.float32) * 5.0 + 1.0
    y_pred = y_true + 0.3 * jax.random.normal(k2, (N, 1), dtype=jnp.float32)

    result = kge_loss(y_pred, y_true)
    jax.block_until_ready(result)

    assert result.shape == (1,)
    assert bool(jnp.isfinite(result[0]))

    # Pure-JAX reference mirroring the PyTorch module.
    def ref_kge(p, t):
        p = jnp.reshape(p, (-1,)).astype(jnp.float32)
        t = jnp.reshape(t, (-1,)).astype(jnp.float32)
        cc = jnp.corrcoef(jnp.stack([p, t]))[0, 1]
        alpha = jnp.std(p, ddof=1) / jnp.std(t, ddof=1)
        beta = jnp.sum(p) / jnp.sum(t)
        return jnp.sqrt((cc - 1.0) ** 2 + (alpha - 1.0) ** 2 + (beta - 1.0) ** 2)

    ref = ref_kge(y_pred, y_true)
    assert bool(jnp.allclose(result[0], ref, rtol=1e-3, atol=1e-5)), (result, ref)

    print("KERNEL_OK")
</pallas_src>

<mosaic_0001>
module attributes {stable_mosaic.version = 11 : i64} {
  func.func @kge_moments_kernel(%arg0: i32, %arg1: i32, %arg2: memref<8x128xf32, #tpu.memory_space<vmem>>, %arg3: memref<8x128xf32, #tpu.memory_space<vmem>>, %arg4: memref<1x5x8x128xf32, #tpu.memory_space<vmem>>) attributes {dimension_semantics = [#tpu.dimension_semantics<parallel>, #tpu.dimension_semantics<arbitrary>], iteration_bounds = array<i64: 2, 1>, scalar_prefetch = 0 : i64, scratch_operands = 0 : i64, tpu.core_type = #tpu.core_type<tc>, window_params = [{transform_indices = @transform_0, window_bounds = array<i64: 8, 128>}, {transform_indices = @transform_1, window_bounds = array<i64: 8, 128>}, {transform_indices = @transform_2, window_bounds = array<i64: 1, 5, 8, 128>}]} {
    %c0_i32 = arith.constant 0 : i32
    %0 = arith.cmpi eq, %arg1, %c0_i32 : i32
    %1 = arith.extui %0 : i1 to i32
    %c0_i32_0 = arith.constant 0 : i32
    %2 = arith.cmpi ne, %1, %c0_i32_0 : i32
    scf.if %2 {
      %cst = arith.constant 0.000000e+00 : f32
      %38 = vector.broadcast %cst : f32 to vector<5x8x128xf32>
      %c0_40 = arith.constant 0 : index
      %c0_41 = arith.constant 0 : index
      %c0_42 = arith.constant 0 : index
      %c0_43 = arith.constant 0 : index
      %39 = vector.load %arg4[%c0_40, %c0_41, %c0_42, %c0_43] : memref<1x5x8x128xf32, #tpu.memory_space<vmem>>, vector<1x5x8x128xf32>
      %40 = vector.shape_cast %39 : vector<1x5x8x128xf32> to vector<5x8x128xf32>
      %41 = vector.shape_cast %38 : vector<5x8x128xf32> to vector<1x5x8x128xf32>
      tpu.vector_store %arg4[%c0_40, %c0_41, %c0_42, %c0_43], %41 {strides = array<i32>} : memref<1x5x8x128xf32, #tpu.memory_space<vmem>>, vector<1x5x8x128xf32>,
    } else {
    }
    %c0 = arith.constant 0 : index
    %c0_1 = arith.constant 0 : index
    %3 = vector.load %arg2[%c0, %c0_1] : memref<8x128xf32, #tpu.memory_space<vmem>>, vector<8x128xf32>
    %c0_2 = arith.constant 0 : index
    %c0_3 = arith.constant 0 : index
    %4 = vector.load %arg3[%c0_2, %c0_3] : memref<8x128xf32, #tpu.memory_space<vmem>>, vector<8x128xf32>
    %c0_4 = arith.constant 0 : index
    %c0_5 = arith.constant 0 : index
    %c0_6 = arith.constant 0 : index
    %c0_7 = arith.constant 0 : index
    %5 = vector.load %arg4[%c0_4, %c0_5, %c0_6, %c0_7] : memref<1x5x8x128xf32, #tpu.memory_space<vmem>>, vector<1x1x8x128xf32>
    %6 = vector.shape_cast %5 : vector<1x1x8x128xf32> to vector<8x128xf32>
    %7 = arith.addf %6, %3 : vector<8x128xf32>
    %c0_8 = arith.constant 0 : index
    %c0_9 = arith.constant 0 : index
    %c0_10 = arith.constant 0 : index
    %c0_11 = arith.constant 0 : index
    %8 = vector.load %arg4[%c0_8, %c0_9, %c0_10, %c0_11] : memref<1x5x8x128xf32, #tpu.memory_space<vmem>>, vector<1x1x8x128xf32>
    %9 = vector.shape_cast %8 : vector<1x1x8x128xf32> to vector<8x128xf32>
    %10 = vector.shape_cast %7 : vector<8x128xf32> to vector<1x1x8x128xf32>
    tpu.vector_store %arg4[%c0_8, %c0_9, %c0_10, %c0_11], %10 {strides = array<i32>} : memref<1x5x8x128xf32, #tpu.memory_space<vmem>>, vector<1x1x8x128xf32>,
    %c0_12 = arith.constant 0 : index
    %c1 = arith.constant 1 : index
    %c0_13 = arith.constant 0 : index
    %c0_14 = arith.constant 0 : index
    %11 = vector.load %arg4[%c0_12, %c1, %c0_13, %c0_14] : memref<1x5x8x128xf32, #tpu.memory_space<vmem>>, vector<1x1x8x128xf32>
    %12 = vector.shape_cast %11 : vector<1x1x8x128xf32> to vector<8x128xf32>
    %13 = arith.addf %12, %4 : vector<8x128xf32>
    %c0_15 = arith.constant 0 : index
    %c1_16 = arith.constant 1 : index
    %c0_17 = arith.constant 0 : index
    %c0_18 = arith.constant 0 : index
    %14 = vector.load %arg4[%c0_15, %c1_16, %c0_17, %c0_18] : memref<1x5x8x128xf32, #tpu.memory_space<vmem>>, vector<1x1x8x128xf32>
    %15 = vector.shape_cast %14 : vector<1x1x8x128xf32> to vector<8x128xf32>
    %16 = vector.shape_cast %13 : vector<8x128xf32> to vector<1x1x8x128xf32>
    tpu.vector_store %arg4[%c0_15, %c1_16, %c0_17, %c0_18], %16 {strides = array<i32>} : memref<1x5x8x128xf32, #tpu.memory_space<vmem>>, vector<1x1x8x128xf32>,
    %c0_19 = arith.constant 0 : index
    %c2 = arith.constant 2 : index
    %c0_20 = arith.constant 0 : index
    %c0_21 = arith.constant 0 : index
    %17 = vector.load %arg4[%c0_19, %c2, %c0_20, %c0_21] : memref<1x5x8x128xf32, #tpu.memory_space<vmem>>, vector<1x1x8x128xf32>
    %18 = vector.shape_cast %17 : vector<1x1x8x128xf32> to vector<8x128xf32>
    %19 = arith.mulf %3, %3 : vector<8x128xf32>
    %20 = arith.addf %18, %19 : vector<8x128xf32>
    %c0_22 = arith.constant 0 : index
    %c2_23 = arith.constant 2 : index
    %c0_24 = arith.constant 0 : index
    %c0_25 = arith.constant 0 : index
    %21 = vector.load %arg4[%c0_22, %c2_23, %c0_24, %c0_25] : memref<1x5x8x128xf32, #tpu.memory_space<vmem>>, vector<1x1x8x128xf32>
    %22 = vector.shape_cast %21 : vector<1x1x8x128xf32> to vector<8x128xf32>
    %23 = vector.shape_cast %20 : vector<8x128xf32> to vector<1x1x8x128xf32>
    tpu.vector_store %arg4[%c0_22, %c2_23, %c0_24, %c0_25], %23 {strides = array<i32>} : memref<1x5x8x128xf32, #tpu.memory_space<vmem>>, vector<1x1x8x128xf32>,
    %c0_26 = arith.constant 0 : index
    %c3 = arith.constant 3 : index
    %c0_27 = arith.constant 0 : index
    %c0_28 = arith.constant 0 : index
    %24 = vector.load %arg4[%c0_26, %c3, %c0_27, %c0_28] : memref<1x5x8x128xf32, #tpu.memory_space<vmem>>, vector<1x1x8x128xf32>
    %25 = vector.shape_cast %24 : vector<1x1x8x128xf32> to vector<8x128xf32>
    %26 = arith.mulf %4, %4 : vector<8x128xf32>
    %27 = arith.addf %25, %26 : vector<8x128xf32>
    %c0_29 = arith.constant 0 : index
    %c3_30 = arith.constant 3 : index
    %c0_31 = arith.constant 0 : index
    %c0_32 = arith.constant 0 : index
    %28 = vector.load %arg4[%c0_29, %c3_30, %c0_31, %c0_32] : memref<1x5x8x128xf32, #tpu.memory_space<vmem>>, vector<1x1x8x128xf32>
    %29 = vector.shape_cast %28 : vector<1x1x8x128xf32> to vector<8x128xf32>
    %30 = vector.shape_cast %27 : vector<8x128xf32> to vector<1x1x8x128xf32>
    tpu.vector_store %arg4[%c0_29, %c3_30, %c0_31, %c0_32], %30 {strides = array<i32>} : memref<1x5x8x128xf32, #tpu.memory_space<vmem>>, vector<1x1x8x128xf32>,
    %c0_33 = arith.constant 0 : index
    %c4 = arith.constant 4 : index
    %c0_34 = arith.constant 0 : index
    %c0_35 = arith.constant 0 : index
    %31 = vector.load %arg4[%c0_33, %c4, %c0_34, %c0_35] : memref<1x5x8x128xf32, #tpu.memory_space<vmem>>, vector<1x1x8x128xf32>
    %32 = vector.shape_cast %31 : vector<1x1x8x128xf32> to vector<8x128xf32>
    %33 = arith.mulf %3, %4 : vector<8x128xf32>
    %34 = arith.addf %32, %33 : vector<8x128xf32>
    %c0_36 = arith.constant 0 : index
    %c4_37 = arith.constant 4 : index
    %c0_38 = arith.constant 0 : index
    %c0_39 = arith.constant 0 : index
    %35 = vector.load %arg4[%c0_36, %c4_37, %c0_38, %c0_39] : memref<1x5x8x128xf32, #tpu.memory_space<vmem>>, vector<1x1x8x128xf32>
    %36 = vector.shape_cast %35 : vector<1x1x8x128xf32> to vector<8x128xf32>
    %37 = vector.shape_cast %34 : vector<8x128xf32> to vector<1x1x8x128xf32>
    tpu.vector_store %arg4[%c0_36, %c4_37, %c0_38, %c0_39], %37 {strides = array<i32>} : memref<1x5x8x128xf32, #tpu.memory_space<vmem>>, vector<1x1x8x128xf32>,
    return
  }
  func.func @transform_0(%arg0: i32, %arg1: i32) -> (i32, i32) {
    %c1_i32 = arith.constant 1 : i32
    %0 = arith.muli %arg0, %c1_i32 : i32
    %1 = arith.addi %0, %arg1 : i32
    %c0_i32 = arith.constant 0 : i32
    %c0_i32_0 = arith.constant 0 : i32
    return %1, %c0_i32 : i32, i32
  }
  func.func @transform_1(%arg0: i32, %arg1: i32) -> (i32, i32) {
    %c1_i32 = arith.constant 1 : i32
    %0 = arith.muli %arg0, %c1_i32 : i32
    %1 = arith.addi %0, %arg1 : i32
    %c0_i32 = arith.constant 0 : i32
    %c0_i32_0 = arith.constant 0 : i32
    return %1, %c0_i32 : i32, i32
  }
  func.func @transform_2(%arg0: i32, %arg1: i32) -> (i32, i32, i32, i32) {
    %c0_i32 = arith.constant 0 : i32
    %c0_i32_0 = arith.constant 0 : i32
    %c0_i32_1 = arith.constant 0 : i32
    %c0_i32_2 = arith.constant 0 : i32
    return %arg0, %c0_i32, %c0_i32_0, %c0_i32_1 : i32, i32, i32, i32
  }
}

</mosaic_0001>

<bundles_post_ra>
// kernel: tpu_custom_call.1
= control target key start
LH: loop header
LB: loop body
LE: loop exit
PB: predicated region body
PF: predicated region fallthrough
CT: control target
= control target key end

     0   :  { %7 = vsyncpa [#allocation3], 0  ;;  %s763_s0 = inlined_call_operand.hbm [shape: f32[16,128], index: 0, kind: input, shape index: {}]   ;;  %s764_s1 = inlined_call_operand.hbm [shape: f32[16,128], index: 1, kind: input, shape index: {}]   ;;  %s765_s2 = inlined_call_operand.hbm [shape: f32[2,5,8,128], index: 2, kind: output, shape index: {}]  }
   0x1   :  { %9 = vsyncpa [#allocation3 + $0x1], 0 }
   0x2   :  { %10 = vsyncpa [#allocation6], 0 }
   0x3   :  { %12 = vsyncpa [#allocation6 + $0x1], 0 }
   0x4   :  { %13 = vsyncpa [#allocation4], 0 }
   0x5   :  { %15 = vsyncpa [#allocation4 + $0x1], 0  ;;  %s634_s9 = smov 0   ;;  %s636_s10 = smov 0  }
   0x6   :  { %s638_s11 = smov 0   ;;  %s640_s12 = smov 0  }
   0x7   :  { %s642_s13 = smov 0   ;;  %s644_s14 = smov 0  }
   0x8 LB: > { %s375_s15 = sadd.s32 4294967295, %s615_s14   ;;  %s376_s16 = sadd.s32 4294967294, %s615_s14   ;;  %s615_s14 = sphi %s644_s14, %s21_s14   ;;  %s611_s13 = sphi %s642_s13, %s774_s13   ;;  %s607_s12 = sphi %s640_s12, %s773_s12   ;;  %s603_s11 = sphi %s638_s11, %s772_s11   ;;  %s599_s10 = sphi %s636_s10, %s771_s10   ;;  %s595_s9 = sphi %s634_s9, %s770_s9  }
   0x9   : > { %s33_s17 = sadd.s32 1, %s611_s13  ;;  %s42_s18 = sadd.s32 1, %s603_s11 }
   0xa   : > { %p35_p0 = scmp.ge.s32.totalorder %s33_s17, 2  ;;  %p49_p1 = scmp.ne.s32.totalorder %s603_s11, %s599_s10 }
   0xb   : > { %p50_p2 = scmp.eq.s32.totalorder %s615_s14, 0  ;;  %p55_p3 = scmp.ne.s32.totalorder %s599_s10, %s595_s9 }
   0xc   : > { %s776_s17 = smov (%p35_p0, %s33_s17), 0  ;;  %p56_p5 = scmp.eq.s32.totalorder %s375_s15, 0 }
   0xd   : > { %p675_p4 = por %p50_p2, %p49_p1  ;;  %s39_s20 = ssub.s32 %s611_s13, %s776_s17 }
   0xe   : > { %p107_p6 = scmp.eq.s32.totalorder %s375_s15, 1  ;;  %p40_p7 = scmp.eq.s32.totalorder %s39_s20, 0 }
   0xf   : > { %p681_p8 = por %p56_p5, %p55_p3  ;;  %p113_p10 = scmp.eq.s32.totalorder %s376_s16, 1 }
  0x10   : > { %p685_p9 = por %p107_p6, %p49_p1  ;;  %p378_p12 = scmp.ge.s32.totalorder %s615_s14, 2 }
  0x11   : > { %s690_s23 = scalar_select %p40_p7, %s603_s11, %s42_s18  }
  0x12   : > { %p692_p11 = por %p113_p10, %p55_p3  ;;  %p416_p13 = scmp.lt.s32.totalorder %s615_s14, 2 }
  0x13   : > { %s133_s25 = sand.u32 1, %s603_s11   ;;  %s380_s27 = sshll.u32 %s611_s13, 3 }
  0x14   : > { %s379_s26 = sshll.u32 %s133_s25, 3  ;;  %s142_s30 = scalar_lea.hbm %s763_s0, %s380_s27 }
  0x15   : > { %s137_s3 = scalar_lea.vmem [#allocation2], %s379_s26  ;;  %s144_s5 = sshll.u32 %s142_s30, 4  ;;  %s145_s5 = int_to_ptr.hbm [resolvable:$true] %s144_s5 }
  0x16   : > { %s146_s4 = sshll.u32 %s137_s3, 4  ;;  %p406_p0 = pnand %p416_p13, %p675_p4  ;;  %s147_s4 = int_to_ptr.vmem [resolvable:$true] %s146_s4 }
  0x17   : > { %p383_p1 = scmp.ge.s32.totalorder %s615_s14, 1  ;;  %p171_p2 = scmp.lt.s32.totalorder %s615_s14, 3 }
  0x18   : > { %s134_s6 = scalar_lea.sflag [#allocation3], %s133_s25  ;;  %s162_s15 = scalar_lea.hbm %s764_s1, %s380_s27 }
  0x19   : > { %408 = dma.hbm_to_vmem [thread:$0]  (!%p406_p0), %s145_s5, 128, %s147_s4, %s134_s6  }
  0x1a   : > { %p172_p3 = pnand %p383_p1, %p171_p2  ;;  %s157_s16 = scalar_lea.vmem [#allocation5], %s379_s26 }
  0x1b   : > { %s166_s18 = sshll.u32 %s157_s16, 4  ;;  %s164_s20 = sshll.u32 %s162_s15, 4  ;;  %s167_s18 = int_to_ptr.vmem [resolvable:$true] %s166_s18  ;;  %s165_s20 = int_to_ptr.hbm [resolvable:$true] %s164_s20 }
  0x1c   : > { %s154_s28 = scalar_lea.sflag [#allocation6], %s133_s25  ;;  %175 = sbr.rel (%p172_p3) target bundleno = 54 (0x36), region = 28 }
  0x1d   : > { %411 = dma.hbm_to_vmem [thread:$0]  (!%p406_p0), %s165_s20, 128, %s167_s18, %s154_s28  }
  0x1e   : > { %s711_s19 = sand.u32 (!%p172_p3), 1, %s599_s10  }
  0x1f   : > { %s384_s29 = sshll.u32 (!%p172_p3), %s711_s19, 3  ;;  %s178_s30 = scalar_lea.sflag (!%p172_p3), [#allocation3], %s711_s19 }
  0x20   : > { %s181_s3 = scalar_lea.vmem (!%p172_p3), [#allocation2], %s384_s29 }
  0x21   : > { %582 = dma.done.wait (%p681_p8), %s178_s30, 128  }
  0x22   : > { %584 = vsyncadd (%p681_p8), %s178_s30, 4294967168  ;;  %s188_s26 = scalar_lea.sflag [#allocation6], %s711_s19  ;;  %s191_s25 = scalar_lea.vmem [#allocation5], %s384_s29 }
  0x23   : > { %586 = dma.done.wait (%p681_p8), %s188_s26, 128  }
  0x24   : > { %588 = vsyncadd (%p681_p8), %s188_s26, 4294967168  ;;  %s397_s27 = smul.u32 40, %s711_s19  ;;  %v229_v0 = vld [vmem:[%s181_s3] sm:$0xff]  ;;  %v230_v1 = vld [vmem:[%s191_s25] sm:$0xff]  ;;  %s549_s29 = scalar_lea.hbm %s765_s2, 80 }
  0x25   : > { %s398_s4 = smul.u32 40, %s607_s12  ;;  %v240_v2 = vmul.f32 %v229_v0, %v229_v0  ;;  %v245_v3 = vmul.f32 %v230_v1, %v230_v1  ;;  %v250_v4 = vmul.f32 %v230_v1, %v229_v0  ;;  %s254_s12 = scalar_lea.sflag [#allocation4], %s711_s19 }
  0x26   : > { %s217_s8 = scalar_lea.vmem [#allocation7], %s397_s27 }
  0x27   : > { %s265_s7 = scalar_lea.hbm %s765_s2, %s398_s4  ;;  %s266_s15 = sshll.u32 %s217_s8, 4  ;;  %233 = vst [vmem:[%s217_s8] sm:$0xff] %v229_v0  ;;  %s267_s15 = int_to_ptr.vmem [resolvable:$true] %s266_s15 }
  0x28   : > { %s268_s16 = sshll.u32 %s265_s7, 4  ;;  %387 = vst [vmem:[%s217_s8 + $0x8] sm:$0xff] %v230_v1  ;;  %s269_s16 = int_to_ptr.hbm [resolvable:$true] %s268_s16 }
  0x29   : > { %389 = vst [vmem:[%s217_s8 + $0x10] sm:$0xff] %v240_v2  ;;  %s543_s21 = sshra.s32 %s269_s16, 4  ;;  %s544_s21 = int_to_ptr.hbm [resolvable:$true] %s543_s21 }
  0x2a   : > { %391 = vst [vmem:[%s217_s8 + $0x18] sm:$0xff] %v245_v3  ;;  %s545_s18 = scalar_lea.hbm %s544_s21, 40  ;;  %p550_p7 = scmp.lt.s32.totalorder %s544_s21, %s765_s2 }
  0x2b   : > { %393 = vst [vmem:[%s217_s8 + $0x20] sm:$0xff] %v250_v4  ;;  %p546_p4 = scmp.ne.s32.totalorder %s544_s21, %s545_s18  ;;  %p551_p8 = scmp.lt.s32.totalorder %s549_s29, %s545_s18 }
  0x2d   : > { %p547_p5 = pnand %p546_p4, %p685_p9  ;;  %p552_p10 = por %p551_p8, %p550_p7 }
  0x2f   : > { %p548_p6 = pneg %p547_p5 }
  0x31   : > { %p553_p13 = pnand %p552_p10, %p548_p6 }
  0x33   : > { %556 = shalt.err (!%p553_p13)
}
  0x34   : > { %s617_s19 = smov 128   ;;  %s618_s26 = smov 8  }
  0x35   : > { %403 = dma.vmem_to_hbm [thread:$0]  (%p685_p9), %s267_s15, 640, %s269_s16, %s254_s12, %s617_s19, %s617_s19, %s618_s26  }
  0x36 PF: > { %s283_s25 = sand.u32 1, %s595_s9   ;;  %p413_p0 = pnand %p378_p12, %p692_p11 }
  0x37   : > { %s284_s27 = scalar_lea.sflag [#allocation4], %s283_s25 }
  0x38   : > { %p414_p1 = pneg %p413_p0 }
  0x3a   : > { %590 = dma.done.wait (%p414_p1), %s284_s27, 640  }
  0x3b   : > { %592 = vsyncadd (%p414_p1), %s284_s27, 4294966656  ;;  %s21_s14 = sadd.s32 1, %s615_s14   ;;  %s770_s9 = smov %s599_s10 }
  0x3c   : > { %p18_p2 = scmp.ge.s32.totalorder %s21_s14, 4   ;;  %s771_s10 = smov %s603_s11 }
  0x3d   : > { %s772_s11 = smov %s690_s23  ;;  %s773_s12 = smov %s611_s13 }
  0x3e   : > { %s774_s13 = smov %s776_s17  ;;  %20 = sbr.rel (!%p18_p2) target bundleno = 8 (0x8), region = 94 }
  0x43   :  { %290 = vsyncpa [#allocation3], 1 }
  0x44   :  { %292 = vsyncpa [#allocation3 + $0x1], 1 }
  0x45   :  { %293 = vsyncpa [#allocation6], 1 }
  0x46   :  { %295 = vsyncpa [#allocation6 + $0x1], 1 }
  0x47   :  { %296 = vsyncpa [#allocation4], 1 }
  0x48   :  { %298 = vsyncpa [#allocation4 + $0x1], 1 }

</bundles_post_ra>
